<compile_context>
chip_gen: v7x
topology: tpu7x:2x2x1
jax: 0.10.0
libtpu: 0.0.40
codegen_flags: <defaults>
</compile_context>

<pallas_src>
import functools

import jax
import jax.numpy as jnp
import numpy as np
from jax.experimental import pallas as pl
from jax.experimental.pallas import tpu as pltpu

GAMMA_NEG = 4.0
GAMMA_POS = 1.0
CLIP = 0.05
EPS = 1e-8


def _acloss_kernel(x_ref, y_ref, out_ref, s_acc, ss_acc, a_acc, w_acc, *, n_total):
    i = pl.program_id(0)          # row-tile index
    j = pl.program_id(1)          # column-tile index
    is_first = jnp.logical_and(i == 0, j == 0)
    is_last = jnp.logical_and(i == pl.num_programs(0) - 1,
                              j == pl.num_programs(1) - 1)

    @pl.when(is_first)
    def _init():
        s_acc[...] = jnp.zeros_like(s_acc)
        ss_acc[...] = jnp.zeros_like(ss_acc)
        a_acc[...] = jnp.zeros_like(a_acc)
        w_acc[...] = jnp.zeros_like(w_acc)

    x = x_ref[...]
    y = y_ref[...]

    xs_pos_c = jnp.maximum(x, EPS)                      # xs_pos.clamp(min=eps)
    xs_neg = jnp.minimum((1.0 - x) + CLIP, 1.0)         # (1-x+clip).clamp(max=1)
    xs_neg_c = jnp.maximum(xs_neg, EPS)

    y_p = jnp.where(y >= 0.9, 1.0, 0.0)                 # hard positive mask
    y_n = jnp.where(y > 0.2, 1.0, 0.0)                  # "not-negative" mask
    y_c = jnp.where(jnp.logical_or(y > 0.9, y < 0.2), 0.0, y)
    y_ct = jnp.where(y_c > 0.0, 1.0, y_c)               # soft-middle indicator

    # Fused log: the y>=0.9 (los_pos) and y<=0.2 (los_neg) regions are disjoint.
    log_arg = jnp.where(y >= 0.9, xs_pos_c, jnp.where(y <= 0.2, xs_neg_c, 1.0))
    base = (y_p + (1.0 - y_n)) * jnp.log(log_arg)       # los_pos + los_neg

    # Focal weight: exponent only takes {1, 2, 4, 5} for gamma_pos=1, gamma_neg=4.
    pt = x * y_p + xs_neg * y_n + y_ct
    g = GAMMA_POS * (y_p + y_ct) + GAMMA_NEG * (1.0 - y_n)   # exact small ints
    p1 = 1.0 - pt
    p2 = p1 * p1
    p4 = p2 * p2
    p5 = p4 * p1
    w = jnp.where(g == 1.0, p1,
                  jnp.where(g == 2.0, p2,
                            jnp.where(g == 4.0, p4, p5)))

    d = y_c - xs_pos_c                                  # variance operand

    # Elementwise (VPU-only) partial accumulation; reductions deferred to the end.
    s_acc[...] += d
    ss_acc[...] += d * d
    a_acc[...] += base * w
    w_acc[...] += w

    @pl.when(is_last)
    def _finalize():
        n = float(n_total)
        s = jnp.sum(s_acc[...])
        ss = jnp.sum(ss_acc[...])
        a = jnp.sum(a_acc[...])
        ws = jnp.sum(w_acc[...])
        # torch.var default: unbiased estimator over all elements (ddof=1)
        los_c = (ss - s * s / n) / (n - 1.0)
        out_ref[0, 0] = -(a + los_c * ws)


def acloss_gs(x, y, *, tile_rows=None, tile_cols=None):
    x = x.astype(jnp.float32)
    y = y.astype(jnp.float32)
    B, C = x.shape

    if tile_cols is None:
        tile_cols = C if C <= 2048 else 2048            # lane-dense column tile
    if tile_rows is None:
        # keep a single input block around <= 2 MiB so that (2 inputs x 2 pipeline
        # buffers + 4 accumulators) stays well inside v7x's 64-MiB VMEM.
        max_rows = max(8, (2 << 20) // (tile_cols * 4))
        tile_rows = B if B <= max_rows else max_rows
    assert C % tile_cols == 0, "num_classes must be divisible by tile_cols"
    assert B % tile_rows == 0, "batch must be divisible by tile_rows"
    assert tile_cols == C or tile_cols % 128 == 0
    assert tile_rows == B or tile_rows % 8 == 0

    n_row_tiles = B // tile_rows
    n_col_tiles = C // tile_cols
    n_total = B * C

    block_bytes = tile_rows * tile_cols * 4
    # 2 inputs x 2 pipeline buffers + 4 f32 accumulators of one block each.
    vmem_need = (2 * 2 + 4) * block_bytes + (2 << 20)
    cp_kwargs = dict(dimension_semantics=("arbitrary", "arbitrary"))
    if vmem_need > (16 << 20):
        # Raise the scoped-VMEM limit (v5e default is 16 MiB) but cap at 48 MiB
        # to leave headroom on v7x (64 MiB physical VMEM).
        cp_kwargs["vmem_limit_bytes"] = int(min(vmem_need, 48 << 20))

    kernel = functools.partial(_acloss_kernel, n_total=n_total)
    out = pl.pallas_call(
        kernel,
        out_shape=jax.ShapeDtypeStruct((1, 1), jnp.float32),
        grid_spec=pltpu.PrefetchScalarGridSpec(
            num_scalar_prefetch=0,
            grid=(n_row_tiles, n_col_tiles),
            in_specs=[
                pl.BlockSpec((tile_rows, tile_cols), lambda i, j: (i, j)),
                pl.BlockSpec((tile_rows, tile_cols), lambda i, j: (i, j)),
            ],
            out_specs=pl.BlockSpec(memory_space=pltpu.MemorySpace.SMEM),
            scratch_shapes=[
                pltpu.VMEM((tile_rows, tile_cols), jnp.float32),  # S partials
                pltpu.VMEM((tile_rows, tile_cols), jnp.float32),  # SS partials
                pltpu.VMEM((tile_rows, tile_cols), jnp.float32),  # A partials
                pltpu.VMEM((tile_rows, tile_cols), jnp.float32),  # W partials
            ],
        ),
        compiler_params=pltpu.CompilerParams(**cp_kwargs),
    )(x, y)
    return out[0, 0]


def acloss_gs_ref(x, y):
    """Pure-JAX reference mirroring the PyTorch forward exactly."""
    xs_pos = x
    xs_neg = jnp.minimum((1.0 - x) + CLIP, 1.0)
    xs_pos_c = jnp.maximum(xs_pos, EPS)

    y_p = jnp.where(y >= 0.9, 1.0, 0.0)
    y_n = jnp.where(y > 0.2, 1.0, 0.0)
    y_c = jnp.where(jnp.logical_or(y > 0.9, y < 0.2), 0.0, y)
    y_ct = jnp.where(y_c > 0.0, 1.0, y_c)

    los_pos = y_p * jnp.log(xs_pos_c)
    los_neg = (1.0 - y_n) * jnp.log(jnp.maximum(xs_neg, EPS))
    los_c = jnp.var(y_c - xs_pos_c, ddof=1)
    loss = los_pos + los_neg + los_c

    pt = xs_pos * y_p + xs_neg * y_n + y_ct
    g = (GAMMA_POS * (y_p + y_ct) + GAMMA_NEG * (1.0 - y_n)).astype(jnp.int32)
    # integer-exponent pow via exponentiation-by-squaring (handles negative base
    # exactly like torch.pow with integer-valued float exponents)
    b = 1.0 - pt
    w = jnp.ones_like(b)
    w = jnp.where((g & 1) != 0, w * b, w)
    b = b * b
    w = jnp.where((g & 2) != 0, w * b, w)
    b = b * b
    w = jnp.where((g & 4) != 0, w * b, w)
    loss = loss * w
    return -jnp.sum(loss)


if __name__ == "__main__":
    key = jax.random.PRNGKey(0)
    kx, ky = jax.random.split(key)
    B, C = 8, 256  # (batch, num_classes) multi-label problem
    # x are probabilities in (0, 1) (the loss assumes already-activated inputs)
    x = jax.random.uniform(kx, (B, C), dtype=jnp.float32, minval=0.01, maxval=0.99)
    # y are soft targets in [0, 1]
    y = jax.random.uniform(ky, (B, C), dtype=jnp.float32)

    out = acloss_gs(x, y)
    jax.block_until_ready(out)

    ref = acloss_gs_ref(x, y)
    assert np.allclose(np.asarray(out), np.asarray(ref), rtol=1e-3, atol=1e-4), (
        float(out), float(ref))
    print("KERNEL_OK")
</pallas_src>

<mosaic_0001>
module attributes {stable_mosaic.version = 11 : i64} {
  func.func @_acloss_kernel(%arg0: i32, %arg1: i32, %arg2: memref<8x256xf32, #tpu.memory_space<vmem>>, %arg3: memref<8x256xf32, #tpu.memory_space<vmem>>, %arg4: memref<1x1xf32, #tpu.memory_space<smem>>, %arg5: memref<8x256xf32, #tpu.memory_space<vmem>>, %arg6: memref<8x256xf32, #tpu.memory_space<vmem>>, %arg7: memref<8x256xf32, #tpu.memory_space<vmem>>, %arg8: memref<8x256xf32, #tpu.memory_space<vmem>>) attributes {dimension_semantics = [#tpu.dimension_semantics<arbitrary>, #tpu.dimension_semantics<arbitrary>], iteration_bounds = array<i64: 1, 1>, scalar_prefetch = 0 : i64, scratch_operands = 4 : i64, tpu.core_type = #tpu.core_type<tc>, window_params = [{transform_indices = @transform_0, window_bounds = array<i64: 8, 256>}, {transform_indices = @transform_1, window_bounds = array<i64: 8, 256>}, {transform_indices = @transform_2, window_bounds = array<i64: 1, 1>}]} {
    %c0_i32 = arith.constant 0 : i32
    %0 = arith.cmpi eq, %arg0, %c0_i32 : i32
    %c0_i32_0 = arith.constant 0 : i32
    %1 = arith.cmpi eq, %arg1, %c0_i32_0 : i32
    %2 = arith.andi %0, %1 : i1
    %c0_i32_1 = arith.constant 0 : i32
    %3 = arith.cmpi eq, %arg0, %c0_i32_1 : i32
    %c0_i32_2 = arith.constant 0 : i32
    %4 = arith.cmpi eq, %arg1, %c0_i32_2 : i32
    %5 = arith.andi %3, %4 : i1
    %6 = arith.extui %2 : i1 to i32
    %c0_i32_3 = arith.constant 0 : i32
    %7 = arith.cmpi ne, %6, %c0_i32_3 : i32
    scf.if %7 {
      %cst_50 = arith.constant 0.000000e+00 : f32
      %96 = vector.broadcast %cst_50 : f32 to vector<8x256xf32>
      %c0_51 = arith.constant 0 : index
      %c0_52 = arith.constant 0 : index
      %97 = vector.load %arg5[%c0_51, %c0_52] : memref<8x256xf32, #tpu.memory_space<vmem>>, vector<8x256xf32>
      tpu.vector_store %arg5[%c0_51, %c0_52], %96 {strides = array<i32>} : memref<8x256xf32, #tpu.memory_space<vmem>>, vector<8x256xf32>,
      %cst_53 = arith.constant 0.000000e+00 : f32
      %98 = vector.broadcast %cst_53 : f32 to vector<8x256xf32>
      %c0_54 = arith.constant 0 : index
      %c0_55 = arith.constant 0 : index
      %99 = vector.load %arg6[%c0_54, %c0_55] : memref<8x256xf32, #tpu.memory_space<vmem>>, vector<8x256xf32>
      tpu.vector_store %arg6[%c0_54, %c0_55], %98 {strides = array<i32>} : memref<8x256xf32, #tpu.memory_space<vmem>>, vector<8x256xf32>,
      %cst_56 = arith.constant 0.000000e+00 : f32
      %100 = vector.broadcast %cst_56 : f32 to vector<8x256xf32>
      %c0_57 = arith.constant 0 : index
      %c0_58 = arith.constant 0 : index
      %101 = vector.load %arg7[%c0_57, %c0_58] : memref<8x256xf32, #tpu.memory_space<vmem>>, vector<8x256xf32>
      tpu.vector_store %arg7[%c0_57, %c0_58], %100 {strides = array<i32>} : memref<8x256xf32, #tpu.memory_space<vmem>>, vector<8x256xf32>,
      %cst_59 = arith.constant 0.000000e+00 : f32
      %102 = vector.broadcast %cst_59 : f32 to vector<8x256xf32>
      %c0_60 = arith.constant 0 : index
      %c0_61 = arith.constant 0 : index
      %103 = vector.load %arg8[%c0_60, %c0_61] : memref<8x256xf32, #tpu.memory_space<vmem>>, vector<8x256xf32>
      tpu.vector_store %arg8[%c0_60, %c0_61], %102 {strides = array<i32>} : memref<8x256xf32, #tpu.memory_space<vmem>>, vector<8x256xf32>,
    } else {
    }
    %c0 = arith.constant 0 : index
    %c0_4 = arith.constant 0 : index
    %8 = vector.load %arg2[%c0, %c0_4] : memref<8x256xf32, #tpu.memory_space<vmem>>, vector<8x256xf32>
    %c0_5 = arith.constant 0 : index
    %c0_6 = arith.constant 0 : index
    %9 = vector.load %arg3[%c0_5, %c0_6] : memref<8x256xf32, #tpu.memory_space<vmem>>, vector<8x256xf32>
    %cst = arith.constant 9.99999993E-9 : f32
    %10 = vector.broadcast %cst : f32 to vector<8x256xf32>
    %11 = arith.maximumf %8, %10 : vector<8x256xf32>
    %cst_7 = arith.constant 1.000000e+00 : f32
    %12 = vector.broadcast %cst_7 : f32 to vector<8x256xf32>
    %13 = arith.subf %12, %8 : vector<8x256xf32>
    %cst_8 = arith.constant 5.000000e-02 : f32
    %14 = vector.broadcast %cst_8 : f32 to vector<8x256xf32>
    %15 = arith.addf %13, %14 : vector<8x256xf32>
    %cst_9 = arith.constant 1.000000e+00 : f32
    %16 = vector.broadcast %cst_9 : f32 to vector<8x256xf32>
    %17 = arith.minimumf %15, %16 : vector<8x256xf32>
    %cst_10 = arith.constant 9.99999993E-9 : f32
    %18 = vector.broadcast %cst_10 : f32 to vector<8x256xf32>
    %19 = arith.maximumf %17, %18 : vector<8x256xf32>
    %cst_11 = arith.constant 0.899999976 : f32
    %20 = vector.broadcast %cst_11 : f32 to vector<8x256xf32>
    %21 = arith.cmpf oge, %9, %20 : vector<8x256xf32>
    %cst_12 = arith.constant 1.000000e+00 : f32
    %cst_13 = arith.constant 0.000000e+00 : f32
    %22 = vector.broadcast %cst_12 : f32 to vector<8x256xf32>
    %23 = vector.broadcast %cst_13 : f32 to vector<8x256xf32>
    %24 = arith.select %21, %22, %23 : vector<8x256xi1>, vector<8x256xf32>
    %cst_14 = arith.constant 2.000000e-01 : f32
    %25 = vector.broadcast %cst_14 : f32 to vector<8x256xf32>
    %26 = arith.cmpf ogt, %9, %25 : vector<8x256xf32>
    %cst_15 = arith.constant 1.000000e+00 : f32
    %cst_16 = arith.constant 0.000000e+00 : f32
    %27 = vector.broadcast %cst_15 : f32 to vector<8x256xf32>
    %28 = vector.broadcast %cst_16 : f32 to vector<8x256xf32>
    %29 = arith.select %26, %27, %28 : vector<8x256xi1>, vector<8x256xf32>
    %cst_17 = arith.constant 0.899999976 : f32
    %30 = vector.broadcast %cst_17 : f32 to vector<8x256xf32>
    %31 = arith.cmpf ogt, %9, %30 : vector<8x256xf32>
    %cst_18 = arith.constant 2.000000e-01 : f32
    %32 = vector.broadcast %cst_18 : f32 to vector<8x256xf32>
    %33 = arith.cmpf olt, %9, %32 : vector<8x256xf32>
    %34 = arith.ori %31, %33 : vector<8x256xi1>
    %cst_19 = arith.constant 0.000000e+00 : f32
    %35 = vector.broadcast %cst_19 : f32 to vector<8x256xf32>
    %36 = arith.select %34, %35, %9 : vector<8x256xi1>, vector<8x256xf32>
    %cst_20 = arith.constant 0.000000e+00 : f32
    %37 = vector.broadcast %cst_20 : f32 to vector<8x256xf32>
    %38 = arith.cmpf ogt, %36, %37 : vector<8x256xf32>
    %cst_21 = arith.constant 1.000000e+00 : f32
    %39 = vector.broadcast %cst_21 : f32 to vector<8x256xf32>
    %40 = arith.select %38, %39, %36 : vector<8x256xi1>, vector<8x256xf32>
    %cst_22 = arith.constant 0.899999976 : f32
    %41 = vector.broadcast %cst_22 : f32 to vector<8x256xf32>
    %42 = arith.cmpf oge, %9, %41 : vector<8x256xf32>
    %cst_23 = arith.constant 2.000000e-01 : f32
    %43 = vector.broadcast %cst_23 : f32 to vector<8x256xf32>
    %44 = arith.cmpf ole, %9, %43 : vector<8x256xf32>
    %cst_24 = arith.constant 1.000000e+00 : f32
    %45 = vector.broadcast %cst_24 : f32 to vector<8x256xf32>
    %46 = arith.select %44, %19, %45 : vector<8x256xi1>, vector<8x256xf32>
    %47 = arith.select %42, %11, %46 : vector<8x256xi1>, vector<8x256xf32>
    %cst_25 = arith.constant 1.000000e+00 : f32
    %48 = vector.broadcast %cst_25 : f32 to vector<8x256xf32>
    %49 = arith.subf %48, %29 : vector<8x256xf32>
    %50 = arith.addf %24, %49 : vector<8x256xf32>
    %51 = math.log %47 : vector<8x256xf32>
    %52 = arith.mulf %50, %51 : vector<8x256xf32>
    %53 = arith.mulf %8, %24 : vector<8x256xf32>
    %54 = arith.mulf %17, %29 : vector<8x256xf32>
    %55 = arith.addf %53, %54 : vector<8x256xf32>
    %56 = arith.addf %55, %40 : vector<8x256xf32>
    %57 = arith.addf %24, %40 : vector<8x256xf32>
    %cst_26 = arith.constant 1.000000e+00 : f32
    %58 = vector.broadcast %cst_26 : f32 to vector<8x256xf32>
    %59 = arith.mulf %58, %57 : vector<8x256xf32>
    %cst_27 = arith.constant 1.000000e+00 : f32
    %60 = vector.broadcast %cst_27 : f32 to vector<8x256xf32>
    %61 = arith.subf %60, %29 : vector<8x256xf32>
    %cst_28 = arith.constant 4.000000e+00 : f32
    %62 = vector.broadcast %cst_28 : f32 to vector<8x256xf32>
    %63 = arith.mulf %62, %61 : vector<8x256xf32>
    %64 = arith.addf %59, %63 : vector<8x256xf32>
    %cst_29 = arith.constant 1.000000e+00 : f32
    %65 = vector.broadcast %cst_29 : f32 to vector<8x256xf32>
    %66 = arith.subf %65, %56 : vector<8x256xf32>
    %67 = arith.mulf %66, %66 : vector<8x256xf32>
    %68 = arith.mulf %67, %67 : vector<8x256xf32>
    %69 = arith.mulf %68, %66 : vector<8x256xf32>
    %cst_30 = arith.constant 1.000000e+00 : f32
    %70 = vector.broadcast %cst_30 : f32 to vector<8x256xf32>
    %71 = arith.cmpf oeq, %64, %70 : vector<8x256xf32>
    %cst_31 = arith.constant 2.000000e+00 : f32
    %72 = vector.broadcast %cst_31 : f32 to vector<8x256xf32>
    %73 = arith.cmpf oeq, %64, %72 : vector<8x256xf32>
    %cst_32 = arith.constant 4.000000e+00 : f32
    %74 = vector.broadcast %cst_32 : f32 to vector<8x256xf32>
    %75 = arith.cmpf oeq, %64, %74 : vector<8x256xf32>
    %76 = arith.select %75, %68, %69 : vector<8x256xi1>, vector<8x256xf32>
    %77 = arith.select %73, %67, %76 : vector<8x256xi1>, vector<8x256xf32>
    %78 = arith.select %71, %66, %77 : vector<8x256xi1>, vector<8x256xf32>
    %79 = arith.subf %36, %11 : vector<8x256xf32>
    %c0_33 = arith.constant 0 : index
    %c0_34 = arith.constant 0 : index
    %80 = vector.load %arg5[%c0_33, %c0_34] : memref<8x256xf32, #tpu.memory_space<vmem>>, vector<8x256xf32>
    %81 = arith.addf %80, %79 : vector<8x256xf32>
    %c0_35 = arith.constant 0 : index
    %c0_36 = arith.constant 0 : index
    %82 = vector.load %arg5[%c0_35, %c0_36] : memref<8x256xf32, #tpu.memory_space<vmem>>, vector<8x256xf32>
    tpu.vector_store %arg5[%c0_35, %c0_36], %81 {strides = array<i32>} : memref<8x256xf32, #tpu.memory_space<vmem>>, vector<8x256xf32>,
    %c0_37 = arith.constant 0 : index
    %c0_38 = arith.constant 0 : index
    %83 = vector.load %arg6[%c0_37, %c0_38] : memref<8x256xf32, #tpu.memory_space<vmem>>, vector<8x256xf32>
    %84 = arith.mulf %79, %79 : vector<8x256xf32>
    %85 = arith.addf %83, %84 : vector<8x256xf32>
    %c0_39 = arith.constant 0 : index
    %c0_40 = arith.constant 0 : index
    %86 = vector.load %arg6[%c0_39, %c0_40] : memref<8x256xf32, #tpu.memory_space<vmem>>, vector<8x256xf32>
    tpu.vector_store %arg6[%c0_39, %c0_40], %85 {strides = array<i32>} : memref<8x256xf32, #tpu.memory_space<vmem>>, vector<8x256xf32>,
    %c0_41 = arith.constant 0 : index
    %c0_42 = arith.constant 0 : index
    %87 = vector.load %arg7[%c0_41, %c0_42] : memref<8x256xf32, #tpu.memory_space<vmem>>, vector<8x256xf32>
    %88 = arith.mulf %52, %78 : vector<8x256xf32>
    %89 = arith.addf %87, %88 : vector<8x256xf32>
    %c0_43 = arith.constant 0 : index
    %c0_44 = arith.constant 0 : index
    %90 = vector.load %arg7[%c0_43, %c0_44] : memref<8x256xf32, #tpu.memory_space<vmem>>, vector<8x256xf32>
    tpu.vector_store %arg7[%c0_43, %c0_44], %89 {strides = array<i32>} : memref<8x256xf32, #tpu.memory_space<vmem>>, vector<8x256xf32>,
    %c0_45 = arith.constant 0 : index
    %c0_46 = arith.constant 0 : index
    %91 = vector.load %arg8[%c0_45, %c0_46] : memref<8x256xf32, #tpu.memory_space<vmem>>, vector<8x256xf32>
    %92 = arith.addf %91, %78 : vector<8x256xf32>
    %c0_47 = arith.constant 0 : index
    %c0_48 = arith.constant 0 : index
    %93 = vector.load %arg8[%c0_47, %c0_48] : memref<8x256xf32, #tpu.memory_space<vmem>>, vector<8x256xf32>
    tpu.vector_store %arg8[%c0_47, %c0_48], %92 {strides = array<i32>} : memref<8x256xf32, #tpu.memory_space<vmem>>, vector<8x256xf32>,
    %94 = arith.extui %5 : i1 to i32
    %c0_i32_49 = arith.constant 0 : i32
    %95 = arith.cmpi ne, %94, %c0_i32_49 : i32
    scf.if %95 {
      %c0_50 = arith.constant 0 : index
      %c0_51 = arith.constant 0 : index
      %96 = vector.load %arg5[%c0_50, %c0_51] : memref<8x256xf32, #tpu.memory_space<vmem>>, vector<8x256xf32>
      %97 = vector.shape_cast %96 : vector<8x256xf32> to vector<1x8x256xf32>
      %cst_52 = arith.constant dense<0.000000e+00> : vector<1xf32>
      %98 = vector.multi_reduction <add>, %97, %cst_52 [1, 2] : vector<1x8x256xf32> to vector<1xf32>
      %99 = vector.shape_cast %98 : vector<1xf32> to vector<1x1x1xf32>
      %100 = vector.extract %99[0, 0, 0] : f32 from vector<1x1x1xf32>
      %c0_53 = arith.constant 0 : index
      %c0_54 = arith.constant 0 : index
      %101 = vector.load %arg6[%c0_53, %c0_54] : memref<8x256xf32, #tpu.memory_space<vmem>>, vector<8x256xf32>
      %102 = vector.shape_cast %101 : vector<8x256xf32> to vector<1x8x256xf32>
      %cst_55 = arith.constant dense<0.000000e+00> : vector<1xf32>
      %103 = vector.multi_reduction <add>, %102, %cst_55 [1, 2] : vector<1x8x256xf32> to vector<1xf32>
      %104 = vector.shape_cast %103 : vector<1xf32> to vector<1x1x1xf32>
      %105 = vector.extract %104[0, 0, 0] : f32 from vector<1x1x1xf32>
      %c0_56 = arith.constant 0 : index
      %c0_57 = arith.constant 0 : index
      %106 = vector.load %arg7[%c0_56, %c0_57] : memref<8x256xf32, #tpu.memory_space<vmem>>, vector<8x256xf32>
      %107 = vector.shape_cast %106 : vector<8x256xf32> to vector<1x8x256xf32>
      %cst_58 = arith.constant dense<0.000000e+00> : vector<1xf32>
      %108 = vector.multi_reduction <add>, %107, %cst_58 [1, 2] : vector<1x8x256xf32> to vector<1xf32>
      %109 = vector.shape_cast %108 : vector<1xf32> to vector<1x1x1xf32>
      %110 = vector.extract %109[0, 0, 0] : f32 from vector<1x1x1xf32>
      %c0_59 = arith.constant 0 : index
      %c0_60 = arith.constant 0 : index
      %111 = vector.load %arg8[%c0_59, %c0_60] : memref<8x256xf32, #tpu.memory_space<vmem>>, vector<8x256xf32>
      %112 = vector.shape_cast %111 : vector<8x256xf32> to vector<1x8x256xf32>
      %cst_61 = arith.constant dense<0.000000e+00> : vector<1xf32>
      %113 = vector.multi_reduction <add>, %112, %cst_61 [1, 2] : vector<1x8x256xf32> to vector<1xf32>
      %114 = vector.shape_cast %113 : vector<1xf32> to vector<1x1x1xf32>
      %115 = vector.extract %114[0, 0, 0] : f32 from vector<1x1x1xf32>
      %116 = arith.mulf %100, %100 : f32
      %cst_62 = arith.constant 2.048000e+03 : f32
      %117 = arith.divf %116, %cst_62 : f32
      %118 = arith.subf %105, %117 : f32
      %cst_63 = arith.constant 2.047000e+03 : f32
      %119 = arith.divf %118, %cst_63 : f32
      %120 = arith.mulf %119, %115 : f32
      %121 = arith.addf %110, %120 : f32
      %cst_64 = arith.constant 0.000000e+00 : f32
      %122 = arith.subf %cst_64, %121 : f32
      %c0_65 = arith.constant 0 : index
      %c0_66 = arith.constant 0 : index
      %123 = memref.load %arg4[%c0_65, %c0_66] : memref<1x1xf32, #tpu.memory_space<smem>>
      memref.store %122, %arg4[%c0_65, %c0_66] : memref<1x1xf32, #tpu.memory_space<smem>>
    } else {
    }
    return
  }
  func.func @transform_0(%arg0: i32, %arg1: i32) -> (i32, i32) {
    %c0_i32 = arith.constant 0 : i32
    return %arg0, %arg1 : i32, i32
  }
  func.func @transform_1(%arg0: i32, %arg1: i32) -> (i32, i32) {
    %c0_i32 = arith.constant 0 : i32
    return %arg0, %arg1 : i32, i32
  }
  func.func @transform_2(%arg0: i32, %arg1: i32) -> (i32, i32) {
    %c0_i32 = arith.constant 0 : i32
    %c0_i32_0 = arith.constant 0 : i32
    %c0_i32_1 = arith.constant 0 : i32
    return %c0_i32, %c0_i32_0 : i32, i32
  }
}

</mosaic_0001>

<bundles_post_ra>
// kernel: tpu_custom_call.1
= control target key start
LH: loop header
LB: loop body
LE: loop exit
PB: predicated region body
PF: predicated region fallthrough
CT: control target
= control target key end

     0   :  { %7 = vsyncpa [#allocation7], 0  ;;  %s391_s0 = inlined_call_operand.hbm [shape: f32[8,256], index: 0, kind: input, shape index: {}]   ;;  %s392_s1 = inlined_call_operand.hbm [shape: f32[8,256], index: 1, kind: input, shape index: {}]   ;;  %s393_s2 = inlined_call_operand.hbm [shape: f32[1,1], index: 2, kind: output, shape index: {}]  }
   0x1   :  { %8 = vsyncpa [#allocation10], 0 }
   0x2   :  { %9 = vsyncpa [#allocation8], 0  ;;  %s318_s9 = smov [#allocation6]   ;;  %s319_s11 = smov [#allocation9]  }
   0x3   :  { %s16_s10 = sshll.u32 %s318_s9, 4  ;;  %s26_s12 = sshll.u32 %s319_s11, 4  ;;  %s17_s10 = int_to_ptr.vmem [resolvable:$true] %s16_s10  ;;  %s27_s12 = int_to_ptr.vmem [resolvable:$true] %s26_s12 }
   0x4   :  { %s258_s15 = scalar_lea.hbm %s391_s0, 256 }
   0x5   :  { %p259_p0 = scmp.ne.s32.totalorder %s391_s0, %s258_s15  ;;  %p262_p1 = scmp.lt.u32.totalorder %s258_s15, %s391_s0 }
   0x7   :  { %p264_p2 = pnand %p262_p1, %p259_p0 }
   0x9   :  { %267 = shalt.err (!%p264_p2)
}
   0xa   :  { %s268_s20 = scalar_lea.vmem %s17_s10, 256  ;;  %p273_p4 = scmp.lt.s32.totalorder %s17_s10, %s17_s10 }
   0xb   :  { %p269_p3 = scmp.ne.s32.totalorder %s17_s10, %s268_s20  ;;  %p274_p5 = scmp.lt.s32.totalorder %s268_s20, %s268_s20 }
   0xd   :  { %p275_p6 = por %p274_p5, %p273_p4 }
   0xf   :  { %p276_p7 = pnand %p275_p6, %p269_p3 }
  0x11   :  { %279 = shalt.err (!%p276_p7)
}
  0x12   :  { %19 = dma.hbm_to_vmem [thread:$0]  %s391_s0, 256, %s17_s10, [#allocation7]  }
  0x13   :  { %s280_s25 = scalar_lea.hbm %s392_s1, 256 }
  0x14   :  { %p281_p8 = scmp.ne.s32.totalorder %s392_s1, %s280_s25  ;;  %p284_p9 = scmp.lt.u32.totalorder %s280_s25, %s392_s1 }
  0x16   :  { %p286_p10 = pnand %p284_p9, %p281_p8 }
  0x18   :  { %289 = shalt.err (!%p286_p10)
}
  0x19   :  { %s290_s30 = scalar_lea.vmem %s27_s12, 256  ;;  %p295_p12 = scmp.lt.s32.totalorder %s27_s12, %s27_s12 }
  0x1a   :  { %p291_p11 = scmp.ne.s32.totalorder %s27_s12, %s290_s30  ;;  %p296_p13 = scmp.lt.s32.totalorder %s290_s30, %s290_s30 }
  0x1c   :  { %p297_p0 = por %p296_p13, %p295_p12 }
  0x1e   :  { %p298_p1 = pnand %p297_p0, %p291_p11 }
  0x20   :  { %301 = shalt.err (!%p298_p1)
}
  0x21   :  { %29 = dma.hbm_to_vmem [thread:$0]  %s392_s1, 256, %s27_s12, [#allocation10]  }
  0x22   :  { %312 = dma.done.wait [#allocation7], 256  }
  0x23   :  { %313 = vsyncadd [#allocation7], 4294967040 }
  0x24   :  { %314 = dma.done.wait [#allocation10], 256  }
  0x25   :  { %315 = vsyncadd [#allocation10], 4294967040  ;;  %v50_v0 = vld [vmem:[#allocation6] sm:$0xff]  ;;  %v51_v1 = vld [vmem:[#allocation6 + $0x8] sm:$0xff]  ;;  %v320_v8 = vmov 0.0   ;;  %s302_s16 = scalar_lea.hbm %s393_s2, 16 }
  0x26   :  { %v52_v2 = vld [vmem:[#allocation9] sm:$0xff]  ;;  %v53_v3 = vld [vmem:[#allocation9 + $0x8] sm:$0xff]  ;;  %v55_v4 = vmax.f32 %v51_v1, 1e-08  ;;  %v56_v5 = vsub.f32 1.0, %v50_v0  ;;  %v57_v6 = vsub.f32 1.0, %v51_v1  ;;  %p303_p2 = scmp.ne.s32.totalorder %s393_s2, %s302_s16  ;;  %p306_p3 = scmp.lt.u32.totalorder %s302_s16, %s393_s2 }
  0x27   :  { %vm64_vm0 = vcmp.ge.f32.partialorder %v52_v2, 0.9  ;;  %vm65_vm1 = vcmp.ge.f32.partialorder %v53_v3, 0.9  ;;  %vm68_vm2 = vcmp.gt.f32.partialorder %v52_v2, 0.2 }
  0x28   :  { %v58_v7 = vadd.f32 0.05, %v56_v5  ;;  %v362_v9 = vsel %vm64_vm0, 1.0, %v320_v8  ;;  %v365_v10 = vsel %vm65_vm1, 1.0, %v320_v8  ;;  %v59_v11 = vadd.f32 0.05, %v57_v6  ;;  %p308_p4 = pnand %p306_p3, %p303_p2 }
  0x29   :  { %vm69_vm3 = vcmp.gt.f32.partialorder %v53_v3, 0.2  ;;  %v367_v12 = vsel %vm68_vm2, 1.0, %v320_v8  ;;  %v100_v13 = vmul.f32 %v362_v9, %v50_v0  ;;  %vm72_vm4 = vcmp.gt.f32.partialorder %v52_v2, 0.9 }
  0x2a   :  { %v60_v14 = vmin.f32 %v58_v7, 1.0  ;;  %v71_v15 = vsel %vm69_vm3, 1.0, %v320_v8  ;;  %vm73_vm5 = vcmp.gt.f32.partialorder %v53_v3, 0.9  ;;  %v61_v16 = vmin.f32 %v59_v11, 1.0 }
  0x2b   :  { %vm74_vm6 = vcmp.lt.f32.partialorder %v52_v2, 0.2  ;;  %vm75_vm7 = vcmp.lt.f32.partialorder %v53_v3, 0.2  ;;  %v101_v17 = vmul.f32 %v365_v10, %v51_v1  ;;  %vm84_vm9 = vcmp.le.f32.partialorder %v52_v2, 0.2 }
  0x2c   :  { %v62_v18 = vmax.f32 %v60_v14, 1e-08  ;;  %vm76_vm8 = vmor %vm72_vm4, %vm74_vm6  ;;  %vm85_vm10 = vcmp.le.f32.partialorder %v53_v3, 0.2  ;;  %v102_v19 = vmul.f32 %v367_v12, %v60_v14  ;;  %v54_v20 = vmax.f32 %v50_v0, 1e-08 }
  0x2d   :  { %v63_v21 = vmax.f32 %v61_v16, 1e-08  ;;  %vm77_vm11 = vmor %vm73_vm5, %vm75_vm7  ;;  %v78_v22 = vsel %vm76_vm8, 0.0, %v52_v2  ;;  %v103_v23 = vmul.f32 %v71_v15, %v61_v16  ;;  %v90_v33 = vsub.f32 1.0, %v367_v12 }
  0x2e   :  { %v79_v24 = vsel %vm77_vm11, 0.0, %v53_v3  ;;  %vm80_vm12 = vcmp.gt.f32.partialorder %v78_v22, 0.0  ;;  %v86_v25 = vsel %vm84_vm9, %v62_v18, 1.0  ;;  %v104_v26 = vadd.f32 %v102_v19, %v100_v13 }
  0x2f   :  { %vm81_vm13 = vcmp.gt.f32.partialorder %v79_v24, 0.0  ;;  %v82_v27 = vsel %vm80_vm12, 1.0, %v78_v22  ;;  %v87_v28 = vsel %vm85_vm10, %v63_v21, 1.0  ;;  %v105_v29 = vadd.f32 %v103_v23, %v101_v17 }
  0x30   :  { %v83_v30 = vsel %vm81_vm13, 1.0, %v79_v24  ;;  %v89_v31 = vsel %vm65_vm1, %v55_v4, %v87_v28  ;;  %v106_v32 = vadd.f32 %v104_v26, %v82_v27  ;;  %v108_v35 = vadd.f32 %v82_v27, %v362_v9 }
  0x31   :  { %v107_v34 = vadd.f32 %v105_v29, %v83_v30  ;;  %v134_v36 = vsub.f32 %v78_v22, %v54_v20  ;;  %v135_v37 = vsub.f32 %v79_v24, %v55_v4  ;;  %v109_v38 = vadd.f32 %v83_v30, %v365_v10 }
  0x32   :  { %v88_v39 = vsel %vm64_vm0, %v54_v20, %v86_v25  ;;  %v91_v40 = vsub.f32 1.0, %v71_v15  ;;  %254 = vlog2.f32 %v89_v31  ;;  %v110_v44 = vmul.f32 4.0, %v90_v33 }
  0x33   :  { %v168_v41 = vadd.f32 %v135_v37, %v134_v36  ;;  %v144_v42 = vmul.f32 %v134_v36, %v134_v36  ;;  %v145_v43 = vmul.f32 %v135_v37, %v135_v37  ;;  %256 = vlog2.f32 %v88_v39 }
  0x34   :  { %v111_v45 = vmul.f32 4.0, %v91_v40  ;;  %v114_v46 = vsub.f32 1.0, %v106_v32  ;;  %v115_v48 = vsub.f32 1.0, %v107_v34  ;;  %v112_v49 = vadd.f32 %v110_v44, %v108_v35 }
  0x35   :  { %169 = vadd.xlane.f32.xlu0 %v168_v41  ;;  %v180_v47 = vadd.f32 %v145_v43, %v144_v42  ;;  %v93_v56 = vadd.f32 %v91_v40, %v365_v10  ;;  %v92_v59 = vadd.f32 %v90_v33, %v362_v9 }
  0x36   :  { %v113_v50 = vadd.f32 %v111_v45, %v109_v38  ;;  %v116_v51 = vmul.f32 %v114_v46, %v114_v46  ;;  %v117_v52 = vmul.f32 %v115_v48, %v115_v48  ;;  %vm126_vm14 = vcmp.eq.f32.partialorder %v112_v49, 4.0 }
  0x37   :  { %vm124_vm15 = vcmp.eq.f32.partialorder %v112_v49, 2.0  ;;  %vm122_vm2 = vcmp.eq.f32.partialorder %v112_v49, 1.0 }
  0x38   :  { %v118_v53 = vmul.f32 %v116_v51, %v116_v51  ;;  %v119_v54 = vmul.f32 %v117_v52, %v117_v52  ;;  %vm127_vm0 = vcmp.eq.f32.partialorder %v113_v50, 4.0  ;;  %vm125_vm1 = vcmp.eq.f32.partialorder %v113_v50, 2.0 }
  0x39   :  { %181 = vadd.xlane.f32.xlu0 %v180_v47  ;;  %vm123_vm3 = vcmp.eq.f32.partialorder %v113_v50, 1.0 }
  0x3a   :  { %v120_v55 = vmul.f32 %v118_v53, %v114_v46  ;;  %v121_v57 = vmul.f32 %v119_v54, %v115_v48 }
  0x3c   :  { %v255_v58 = vpop.eup %254  ;;  %v128_v60 = vsel %vm126_vm14, %v118_v53, %v120_v55  ;;  %v129_v63 = vsel %vm127_vm0, %v119_v54, %v121_v57 }
  0x3d   :  { %v257_v61 = vpop.eup %256  ;;  %v97_v62 = vmul.f32 0.6931472, %v255_v58  ;;  %v130_v0 = vsel %vm124_vm15, %v116_v51, %v128_v60  ;;  %v131_v2 = vsel %vm125_vm1, %v117_v52, %v129_v63 }
  0x3e   :  { %v95_v1 = vmul.f32 0.6931472, %v257_v61  ;;  %v132_v4 = vsel %vm122_vm2, %v114_v46, %v130_v0  ;;  %v133_v5 = vsel %vm123_vm3, %v115_v48, %v131_v2 }
  0x3f   :  { %v99_v3 = vmul.f32 %v97_v62, %v93_v56  ;;  %v204_v11 = vadd.f32 %v133_v5, %v132_v4 }
  0x40   :  { %v98_v6 = vmul.f32 %v95_v1, %v92_v59 }
  0x41   :  { %v153_v7 = vmul.f32 %v133_v5, %v99_v3 }
  0x42   :  { %v152_v8 = vmul.f32 %v132_v4, %v98_v6 }
  0x44   :  { %v192_v10 = vadd.f32 %v153_v7, %v152_v8 }
  0x46   :  { %193 = vadd.xlane.f32.xlu1 %v192_v10 }
  0x4a   :  { %205 = vadd.xlane.f32.xlu1 %v204_v11 }
  0xc2   :  { %v170_v9 = vpop.xlane.xlu0 %169 }
  0xc3   :  { %v171_v12 = vrot.slane %v170_v9, 4 }
  0xc5   :  { %v172_v13 = vadd.f32 %v171_v12, %v170_v9 }
  0xc6   :  { %v182_v14 = vpop.xlane.xlu0 %181 }
  0xc7   :  { %v173_v15 = vrot.slane %v172_v13, 2  ;;  %v183_v16 = vrot.slane %v182_v14, 4 }
  0xc9   :  { %v184_v17 = vadd.f32 %v183_v16, %v182_v14  ;;  %v174_v18 = vadd.f32 %v173_v15, %v172_v13 }
  0xcb   :  { %v185_v19 = vrot.slane %v184_v17, 2  ;;  %v175_v20 = vrot.slane %v174_v18, 1 }
  0xcd   :  { %v186_v21 = vadd.f32 %v185_v19, %v184_v17  ;;  %v176_v22 = vadd.f32 %v175_v20, %v174_v18 }
  0xcf   :  { %242 = vpush %v176_v22  ;;  %v187_v23 = vrot.slane %v186_v21, 1 }
  0xd1   :  { %v188_v24 = vadd.f32 %v187_v23, %v186_v21 }
  0xd3   :  { %v194_v25 = vpop.xlane.xlu1 %193  ;;  %244 = vpush %v188_v24 }
  0xd4   :  { %v195_v26 = vrot.slane %v194_v25, 4 }
  0xd6   :  { %v196_v27 = vadd.f32 %v195_v26, %v194_v25 }
  0xd7   :  { %v206_v28 = vpop.xlane.xlu1 %205 }
  0xd8   :  { %v197_v29 = vrot.slane %v196_v27, 2  ;;  %v207_v30 = vrot.slane %v206_v28, 4 }
  0xda   :  { %v208_v31 = vadd.f32 %v207_v30, %v206_v28  ;;  %v198_v32 = vadd.f32 %v197_v29, %v196_v27 }
  0xdc   :  { %v209_v33 = vrot.slane %v208_v31, 2  ;;  %v199_v34 = vrot.slane %v198_v32, 1 }
  0xde   :  { %v210_v35 = vadd.f32 %v209_v33, %v208_v31  ;;  %v200_v36 = vadd.f32 %v199_v34, %v198_v32 }
  0xe0   :  { %246 = vpush %v200_v36  ;;  %v211_v37 = vrot.slane %v210_v35, 1 }
  0xe2   :  { %v212_v38 = vadd.f32 %v211_v37, %v210_v35 }
  0xe4   :  { %248 = vpush %v212_v38 }
 0x100   :  { %s243_s1 = spop %242 }
 0x101   :  { %s214_s4 = smul.f32 %s243_s1, %s243_s1 }
 0x103   :  { %s217_s5 = smul.f32 0.00048828125, %s214_s4 }
 0x104   :  { %s245_s6 = spop %244 }
 0x105   :  { %s218_s7 = ssub.f32 %s245_s6, %s217_s5 }
 0x107   :  { %s221_s8 = smul.f32 0.0004885198, %s218_s7 }
 0x111   :  { %s247_s9 = spop %246 }
 0x115   :  { %s249_s10 = spop %248 }
 0x116   :  { %s222_s11 = smul.f32 %s249_s10, %s221_s8 }
 0x118   :  { %s223_s12 = sadd.f32 %s247_s9, %s222_s11 }
 0x11a   :  { %s224_s13 = ssub.f32 0.0, %s223_s12 }
 0x11c   :  { %226 = sst [smem:[#allocation11]] %s224_s13 }
 0x11d   :  { %311 = shalt.err (!%p308_p4)
}
 0x11e   :  { %s321_s21 = smov [#allocation11]  }
 0x11f   :  { %234 = dma.smem_to_hbm %s321_s21, 16, %s393_s2, [#allocation8]  }
 0x120   :  { %316 = dma.done.wait [#allocation8], 16  }
 0x121   :  { %317 = vsyncadd [#allocation8], 4294967280 }
 0x122   :  { %238 = sfence }
 0x123   :  { %239 = vsyncpa [#allocation7], 1 }
 0x124   :  { %240 = vsyncpa [#allocation10], 1 }
 0x125   :  { %241 = vsyncpa [#allocation8], 1 }

</bundles_post_ra>
